<compile_context>
chip_gen: v7x
topology: tpu7x:2x2x1
jax: 0.10.0
libtpu: 0.0.40
codegen_flags: <defaults>
</compile_context>

<pallas_src>
import functools

import jax
import jax.numpy as jnp
from jax.experimental import pallas as pl
from jax.experimental.pallas import tpu as pltpu


# ----------------------------- Pallas kernel ------------------------------- #

def _conv_pool_kernel(a_ref, w_ref, mean_ref, std_ref, sum_ref, sq_ref, *, spatial):
    """One (TM, K) patch tile of one image: matmul+ReLU, accumulate sum / sum-of-squares.

    a_ref:   (TM, K) bf16 im2col rows of image `n = program_id(0)`
    w_ref:   (K, C)  bf16 conv weight matrix
    mean_ref/std_ref: (1, 1, C) f32 output blocks for image n (written on last step)
    sum_ref/sq_ref:   (1, C)    f32 VMEM accumulators (persist across the grid)
    """
    m = pl.program_id(1)

    @pl.when(m == 0)
    def _():
        sum_ref[...] = jnp.zeros_like(sum_ref)
        sq_ref[...] = jnp.zeros_like(sq_ref)

    f = jnp.dot(a_ref[...], w_ref[...], preferred_element_type=jnp.float32)
    f = jnp.maximum(f, 0.0)                                   # ReLU
    sum_ref[...] += jnp.sum(f, axis=0, keepdims=True)
    sq_ref[...] += jnp.sum(f * f, axis=0, keepdims=True)

    @pl.when(m == pl.num_programs(1) - 1)
    def _():
        inv_l = 1.0 / spatial                                  # adaptive_avg_pool2d(x, 1)
        inv_lm1 = 1.0 / max(spatial - 1, 1)                    # torch.std: unbiased (ddof=1)
        mean = sum_ref[...] * inv_l
        var = jnp.maximum(sq_ref[...] - spatial * mean * mean, 0.0) * inv_lm1
        mean_ref[...] = mean.reshape(mean_ref.shape)
        std_ref[...] = jnp.sqrt(var).reshape(std_ref.shape)


# ------------------------------ pallas_call wrapper ------------------------- #

def _round_up(x, m):
    return (x + m - 1) // m * m


def conv_relu_pool(patches, w_mat, n, spatial):
    """patches: (n*spatial, K) f32 im2col rows (image-major, spatial inner),
    w_mat: (K, C).  Returns (mean, std), each (n, 1, C) f32, of relu(patches @ w_mat)
    pooled over the spatial axis per (image, channel)."""
    k = patches.shape[1]
    c = w_mat.shape[1]

    # Row-tile size: <=512 rows per step, multiple of 8 (sublane), tiny in VMEM
    # (2 * 512 * 27 * 2B double-buffered) on every TPU generation.
    tm = min(512, _round_up(spatial, 8))
    spatial_p = _round_up(spatial, tm)
    m_tiles = spatial_p // tm
    if spatial_p != spatial:
        # Zero-padded rows produce zero after conv (no bias) + ReLU, so they contribute
        # nothing to sum / sum-of-squares -> mean/std stay exact while tiles stay aligned.
        p3 = patches.reshape(n, spatial, k)
        p3 = jnp.pad(p3, ((0, 0), (0, spatial_p - spatial), (0, 0)))
        patches = p3.reshape(n * spatial_p, k)

    # bf16 inputs (native MXU dtype, halves the dominant HBM stream); f32 accumulation.
    patches = patches.astype(jnp.bfloat16)
    w_mat = w_mat.astype(jnp.bfloat16)

    kernel = functools.partial(_conv_pool_kernel, spatial=spatial)
    cost = pl.CostEstimate(
        flops=2 * n * spatial_p * k * c + 3 * n * spatial_p * c,
        transcendentals=0,
        bytes_accessed=2 * n * spatial_p * k + 2 * k * c + 2 * 4 * n * c,
    )

    mean, std = pl.pallas_call(
        kernel,
        out_shape=(
            jax.ShapeDtypeStruct((n, 1, c), jnp.float32),
            jax.ShapeDtypeStruct((n, 1, c), jnp.float32),
        ),
        grid_spec=pltpu.PrefetchScalarGridSpec(
            num_scalar_prefetch=0,
            grid=(n, m_tiles),
            in_specs=[
                pl.BlockSpec((tm, k), lambda i, m: (i * m_tiles + m, 0)),
                pl.BlockSpec((k, c), lambda i, m: (0, 0)),
            ],
            out_specs=(
                pl.BlockSpec((1, 1, c), lambda i, m: (i, 0, 0)),
                pl.BlockSpec((1, 1, c), lambda i, m: (i, 0, 0)),
            ),
            scratch_shapes=[
                pltpu.VMEM((1, c), jnp.float32),
                pltpu.VMEM((1, c), jnp.float32),
            ],
        ),
        compiler_params=pltpu.CompilerParams(
            dimension_semantics=("parallel", "arbitrary"),
        ),
        cost_estimate=cost,
    )(patches, w_mat)
    return mean, std


# ------------------------------ glue (plain JAX) ---------------------------- #

def _im2col(x, kh, kw, stride, pad):
    """x: (N, C, H, W) -> patches (N*Ho*Wo, C*kh*kw), Ho, Wo."""
    # Note: for real ResNet-stem sizes this 9x expansion could be replaced by in-kernel
    # gathers of the padded input; at the sizes used here it is read exactly once.
    N, C, H, W = x.shape
    xp = jnp.pad(x, ((0, 0), (0, 0), (pad, pad), (pad, pad)))
    Ho = (H + 2 * pad - kh) // stride + 1
    Wo = (W + 2 * pad - kw) // stride + 1
    cols = []
    for i in range(kh):
        for j in range(kw):
            cols.append(xp[:, :, i:i + stride * Ho:stride, j:j + stride * Wo:stride])
    p = jnp.stack(cols, axis=2)                         # (N, C, kh*kw, Ho, Wo)
    p = p.transpose(0, 3, 4, 1, 2).reshape(N * Ho * Wo, C * kh * kw)
    return p, Ho, Wo


class CNNModelPallas:
    """JAX/Pallas equivalent of CNNModel (default 'ResNet-50' branch)."""

    def __init__(self, key, c_in=3, c_out=64):
        self.c_in = c_in
        self.c_out = c_out
        # deterministic synthetic stem weight, PyTorch conv layout (C_out, C_in, kh, kw)
        self.w = 0.1 * jax.random.normal(key, (c_out, c_in, 3, 3), dtype=jnp.float32)

    def __call__(self, x):
        n = x.shape[0]
        patches, ho, wo = _im2col(x, 3, 3, stride=2, pad=1)
        w_mat = self.w.reshape(self.c_out, -1).T              # (C_in*9, C_out)
        mean, std = conv_relu_pool(patches, w_mat, n, ho * wo)  # (n, 1, C) each
        features_mean = jnp.transpose(mean, (0, 2, 1)).reshape(n, self.c_out, 1, 1)
        features_std = jnp.transpose(std, (0, 2, 1)).reshape(n, self.c_out, 1, 1)
        return features_mean, features_std


# ---------------------------------- main ------------------------------------ #

if __name__ == "__main__":
    key = jax.random.PRNGKey(0)
    k_w, k_x = jax.random.split(key)

    model = CNNModelPallas(k_w, c_in=3, c_out=64)
    x = jax.random.normal(k_x, (2, 3, 64, 64), dtype=jnp.float32)  # NCHW

    features_mean, features_std = model(x)
    features_mean, features_std = jax.block_until_ready((features_mean, features_std))

    # reference check in plain JAX (same bf16 inputs / f32 accumulation as the kernel)
    patches, Ho, Wo = _im2col(x, 3, 3, stride=2, pad=1)
    wb = model.w.reshape(model.c_out, -1).T.astype(jnp.bfloat16)
    pb = patches.astype(jnp.bfloat16)
    feat_ref = jnp.maximum(jnp.dot(pb, wb, preferred_element_type=jnp.float32), 0.0)
    feat_ref = feat_ref.reshape(2, Ho * Wo, model.c_out)
    mean_ref = feat_ref.mean(axis=1).reshape(2, model.c_out, 1, 1)
    std_ref = jnp.std(feat_ref, axis=1, ddof=1).reshape(2, model.c_out, 1, 1)

    assert features_mean.shape == (2, 64, 1, 1) and features_std.shape == (2, 64, 1, 1)
    assert jnp.allclose(features_mean, mean_ref, atol=1e-3, rtol=1e-3)
    assert jnp.allclose(features_std, std_ref, atol=1e-3, rtol=1e-3)

    print("KERNEL_OK")
</pallas_src>

<mosaic_0001>
module attributes {stable_mosaic.version = 11 : i64} {
  func.func @_conv_pool_kernel(%arg0: i32, %arg1: i32, %arg2: memref<512x27xbf16, #tpu.memory_space<vmem>>, %arg3: memref<27x64xbf16, #tpu.memory_space<vmem>>, %arg4: memref<1x1x64xf32, #tpu.memory_space<vmem>>, %arg5: memref<1x1x64xf32, #tpu.memory_space<vmem>>, %arg6: memref<1x64xf32, #tpu.memory_space<vmem>>, %arg7: memref<1x64xf32, #tpu.memory_space<vmem>>) attributes {dimension_semantics = [#tpu.dimension_semantics<parallel>, #tpu.dimension_semantics<arbitrary>], iteration_bounds = array<i64: 2, 2>, scalar_prefetch = 0 : i64, scratch_operands = 2 : i64, tpu.core_type = #tpu.core_type<tc>, window_params = [{transform_indices = @transform_0, window_bounds = array<i64: 512, 27>}, {pipeline_mode = #tpu.pipeline_mode<synchronous>, transform_indices = @transform_1, window_bounds = array<i64: 27, 64>}, {transform_indices = @transform_2, window_bounds = array<i64: 1, 1, 64>}, {transform_indices = @transform_3, window_bounds = array<i64: 1, 1, 64>}]} {
    %c0_i32 = arith.constant 0 : i32
    %0 = arith.cmpi eq, %arg1, %c0_i32 : i32
    %1 = arith.extui %0 : i1 to i32
    %c0_i32_0 = arith.constant 0 : i32
    %2 = arith.cmpi ne, %1, %c0_i32_0 : i32
    scf.if %2 {
      %cst_16 = arith.constant 0.000000e+00 : f32
      %22 = vector.broadcast %cst_16 : f32 to vector<1x64xf32>
      %c0_17 = arith.constant 0 : index
      %c0_18 = arith.constant 0 : index
      %23 = vector.load %arg6[%c0_17, %c0_18] : memref<1x64xf32, #tpu.memory_space<vmem>>, vector<1x64xf32>
      tpu.vector_store %arg6[%c0_17, %c0_18], %22 {strides = array<i32>} : memref<1x64xf32, #tpu.memory_space<vmem>>, vector<1x64xf32>,
      %cst_19 = arith.constant 0.000000e+00 : f32
      %24 = vector.broadcast %cst_19 : f32 to vector<1x64xf32>
      %c0_20 = arith.constant 0 : index
      %c0_21 = arith.constant 0 : index
      %25 = vector.load %arg7[%c0_20, %c0_21] : memref<1x64xf32, #tpu.memory_space<vmem>>, vector<1x64xf32>
      tpu.vector_store %arg7[%c0_20, %c0_21], %24 {strides = array<i32>} : memref<1x64xf32, #tpu.memory_space<vmem>>, vector<1x64xf32>,
    } else {
    }
    %c0 = arith.constant 0 : index
    %c0_1 = arith.constant 0 : index
    %3 = vector.load %arg2[%c0, %c0_1] : memref<512x27xbf16, #tpu.memory_space<vmem>>, vector<512x27xbf16>
    %c0_2 = arith.constant 0 : index
    %c0_3 = arith.constant 0 : index
    %4 = vector.load %arg3[%c0_2, %c0_3] : memref<27x64xbf16, #tpu.memory_space<vmem>>, vector<27x64xbf16>
    %cst = arith.constant dense<0.000000e+00> : vector<512x64xf32>
    %5 = tpu.matmul %3, %4, %cst {dimension_numbers = #tpu.dot_dimension_numbers<[1], [0], [0], [1], [0, 0, 1, 1], [], []>} : vector<512x27xbf16>, vector<27x64xbf16>, vector<512x64xf32> -> vector<512x64xf32>
    %cst_4 = arith.constant 0.000000e+00 : f32
    %6 = vector.broadcast %cst_4 : f32 to vector<512x64xf32>
    %7 = arith.maximumf %5, %6 : vector<512x64xf32>
    %c0_5 = arith.constant 0 : index
    %c0_6 = arith.constant 0 : index
    %8 = vector.load %arg6[%c0_5, %c0_6] : memref<1x64xf32, #tpu.memory_space<vmem>>, vector<1x64xf32>
    %cst_7 = arith.constant dense<0.000000e+00> : vector<64xf32>
    %9 = vector.multi_reduction <add>, %7, %cst_7 [0] : vector<512x64xf32> to vector<64xf32>
    %10 = vector.shape_cast %9 : vector<64xf32> to vector<1x64xf32>
    %11 = arith.addf %8, %10 : vector<1x64xf32>
    %c0_8 = arith.constant 0 : index
    %c0_9 = arith.constant 0 : index
    %12 = vector.load %arg6[%c0_8, %c0_9] : memref<1x64xf32, #tpu.memory_space<vmem>>, vector<1x64xf32>
    tpu.vector_store %arg6[%c0_8, %c0_9], %11 {strides = array<i32>} : memref<1x64xf32, #tpu.memory_space<vmem>>, vector<1x64xf32>,
    %c0_10 = arith.constant 0 : index
    %c0_11 = arith.constant 0 : index
    %13 = vector.load %arg7[%c0_10, %c0_11] : memref<1x64xf32, #tpu.memory_space<vmem>>, vector<1x64xf32>
    %14 = arith.mulf %7, %7 : vector<512x64xf32>
    %cst_12 = arith.constant dense<0.000000e+00> : vector<64xf32>
    %15 = vector.multi_reduction <add>, %14, %cst_12 [0] : vector<512x64xf32> to vector<64xf32>
    %16 = vector.shape_cast %15 : vector<64xf32> to vector<1x64xf32>
    %17 = arith.addf %13, %16 : vector<1x64xf32>
    %c0_13 = arith.constant 0 : index
    %c0_14 = arith.constant 0 : index
    %18 = vector.load %arg7[%c0_13, %c0_14] : memref<1x64xf32, #tpu.memory_space<vmem>>, vector<1x64xf32>
    tpu.vector_store %arg7[%c0_13, %c0_14], %17 {strides = array<i32>} : memref<1x64xf32, #tpu.memory_space<vmem>>, vector<1x64xf32>,
    %c1_i32 = arith.constant 1 : i32
    %19 = arith.cmpi eq, %arg1, %c1_i32 : i32
    %20 = arith.extui %19 : i1 to i32
    %c0_i32_15 = arith.constant 0 : i32
    %21 = arith.cmpi ne, %20, %c0_i32_15 : i32
    scf.if %21 {
      %c0_16 = arith.constant 0 : index
      %c0_17 = arith.constant 0 : index
      %22 = vector.load %arg6[%c0_16, %c0_17] : memref<1x64xf32, #tpu.memory_space<vmem>>, vector<1x64xf32>
      %cst_18 = arith.constant 9.765625E-4 : f32
      %23 = vector.broadcast %cst_18 : f32 to vector<1x64xf32>
      %24 = arith.mulf %22, %23 : vector<1x64xf32>
      %c0_19 = arith.constant 0 : index
      %c0_20 = arith.constant 0 : index
      %25 = vector.load %arg7[%c0_19, %c0_20] : memref<1x64xf32, #tpu.memory_space<vmem>>, vector<1x64xf32>
      %cst_21 = arith.constant 1.024000e+03 : f32
      %26 = vector.broadcast %cst_21 : f32 to vector<1x64xf32>
      %27 = arith.mulf %26, %24 : vector<1x64xf32>
      %28 = arith.mulf %27, %24 : vector<1x64xf32>
      %29 = arith.subf %25, %28 : vector<1x64xf32>
      %cst_22 = arith.constant 0.000000e+00 : f32
      %30 = vector.broadcast %cst_22 : f32 to vector<1x64xf32>
      %31 = arith.maximumf %29, %30 : vector<1x64xf32>
      %cst_23 = arith.constant 9.77517105E-4 : f32
      %32 = vector.broadcast %cst_23 : f32 to vector<1x64xf32>
      %33 = arith.mulf %31, %32 : vector<1x64xf32>
      %34 = vector.shape_cast %24 : vector<1x64xf32> to vector<1x1x64xf32>
      %c0_24 = arith.constant 0 : index
      %c0_25 = arith.constant 0 : index
      %c0_26 = arith.constant 0 : index
      %35 = vector.load %arg4[%c0_24, %c0_25, %c0_26] : memref<1x1x64xf32, #tpu.memory_space<vmem>>, vector<1x1x64xf32>
      tpu.vector_store %arg4[%c0_24, %c0_25, %c0_26], %34 {strides = array<i32>} : memref<1x1x64xf32, #tpu.memory_space<vmem>>, vector<1x1x64xf32>,
      %36 = math.sqrt %33 : vector<1x64xf32>
      %37 = vector.shape_cast %36 : vector<1x64xf32> to vector<1x1x64xf32>
      %c0_27 = arith.constant 0 : index
      %c0_28 = arith.constant 0 : index
      %c0_29 = arith.constant 0 : index
      %38 = vector.load %arg5[%c0_27, %c0_28, %c0_29] : memref<1x1x64xf32, #tpu.memory_space<vmem>>, vector<1x1x64xf32>
      tpu.vector_store %arg5[%c0_27, %c0_28, %c0_29], %37 {strides = array<i32>} : memref<1x1x64xf32, #tpu.memory_space<vmem>>, vector<1x1x64xf32>,
    } else {
    }
    return
  }
  func.func @transform_0(%arg0: i32, %arg1: i32) -> (i32, i32) {
    %c2_i32 = arith.constant 2 : i32
    %0 = arith.muli %arg0, %c2_i32 : i32
    %1 = arith.addi %0, %arg1 : i32
    %c0_i32 = arith.constant 0 : i32
    %c0_i32_0 = arith.constant 0 : i32
    return %1, %c0_i32 : i32, i32
  }
  func.func @transform_1(%arg0: i32, %arg1: i32) -> (i32, i32) {
    %c0_i32 = arith.constant 0 : i32
    %c0_i32_0 = arith.constant 0 : i32
    %c0_i32_1 = arith.constant 0 : i32
    return %c0_i32, %c0_i32_0 : i32, i32
  }
  func.func @transform_2(%arg0: i32, %arg1: i32) -> (i32, i32, i32) {
    %c0_i32 = arith.constant 0 : i32
    %c0_i32_0 = arith.constant 0 : i32
    %c0_i32_1 = arith.constant 0 : i32
    return %arg0, %c0_i32, %c0_i32_0 : i32, i32, i32
  }
  func.func @transform_3(%arg0: i32, %arg1: i32) -> (i32, i32, i32) {
    %c0_i32 = arith.constant 0 : i32
    %c0_i32_0 = arith.constant 0 : i32
    %c0_i32_1 = arith.constant 0 : i32
    return %arg0, %c0_i32, %c0_i32_0 : i32, i32, i32
  }
}

</mosaic_0001>

<bundles_post_ra>
// kernel: tpu_custom_call.1
= control target key start
LH: loop header
LB: loop body
LE: loop exit
PB: predicated region body
PF: predicated region fallthrough
CT: control target
= control target key end

     0   :  { %9 = vsyncpa [#allocation5], 0  ;;  %s2315_s0 = inlined_call_operand.vmem [shape: bf16[2048,27], index: 0, kind: input, shape index: {}]   ;;  %s2316_s1 = inlined_call_operand.vmem [shape: bf16[27,64], index: 1, kind: input, shape index: {}]   ;;  %s2317_s2 = inlined_call_operand.hbm [shape: f32[2,1,64], index: 2, kind: output, shape index: {0}]   ;;  %s2318_s3 = inlined_call_operand.hbm [shape: f32[2,1,64], index: 3, kind: output, shape index: {1}]  }
   0x1   :  { %11 = vsyncpa [#allocation5 + $0x1], 0 }
   0x2   :  { %12 = vsyncpa [#allocation7], 0 }
   0x3   :  { %14 = vsyncpa [#allocation7 + $0x1], 0  ;;  %s1847_s12 = smov 0   ;;  %s1849_s13 = smov 0  }
   0x4   :  { %s1851_s14 = smov 0   ;;  %s1853_s15 = smov 0  }
   0x5   :  { %s1855_s16 = smov 0   ;;  %s1857_s17 = smov 0  }
   0x6   :  { %s1859_s18 = smov 0   ;;  %s1861_s19 = smov 0  }
   0x7 LB: > { %s1393_s20 = sadd.s32 4294967295, %s1821_s19   ;;  %s1394_s21 = sadd.s32 4294967294, %s1821_s19   ;;  %s1821_s19 = sphi %s1861_s19, %s20_s19   ;;  %s1817_s18 = sphi %s1859_s18, %s2327_s18   ;;  %s1813_s17 = sphi %s1857_s17, %s2326_s17   ;;  %s1809_s16 = sphi %s1855_s16, %s2325_s16   ;;  %s1805_s15 = sphi %s1853_s15, %s2324_s15   ;;  %s1801_s14 = sphi %s1851_s14, %s2323_s14   ;;  %s1797_s13 = sphi %s1849_s13, %s2322_s13   ;;  %s1793_s12 = sphi %s1847_s12, %s2321_s12  }
   0x8   : > { %s29_s22 = sadd.s32 1, %s1813_s17  ;;  %s32_s23 = sadd.s32 1, %s1817_s18 }
   0x9   : > { %p30_p0 = scmp.ge.s32.totalorder %s29_s22, 2  ;;  %p100_p1 = scmp.ne.s32.totalorder %s1801_s14, %s1797_s13 }
   0xa   : > { %p101_p2 = scmp.eq.s32.totalorder %s1393_s20, 3  ;;  %p106_p4 = scmp.ne.s32.totalorder %s1797_s13, %s1793_s12 }
   0xb   : > { %s2329_s22 = smov (%p30_p0, %s29_s22), 0  ;;  %s2331_s23 = smov (!%p30_p0, %s32_s23), %s1817_s18 }
   0xc   : > { %p1896_p3 = por %p101_p2, %p100_p1  ;;  %p34_p5 = scmp.ge.s32.totalorder %s2331_s23, 2 }
   0xd   : > { %p107_p6 = scmp.eq.s32.totalorder %s1394_s21, 3  ;;  %p1399_p7 = scmp.ge.s32.totalorder %s1821_s19, 1 }
   0xe   : > { %p167_p8 = scmp.lt.s32.totalorder %s1821_s19, 5  ;;  %s2333_s23 = smov (%p34_p5, %s2331_s23), 0 }
   0xf   : > { %p1906_p9 = por %p107_p6, %p106_p4  ;;  %s87_s26 = ssub.s32 %s1817_s18, %s2333_s23 }
  0x10   : > { %p168_p10 = pnand %p1399_p7, %p167_p8  ;;  %s90_s27 = sadd.s32 1, %s1801_s14 }
  0x11   : > { %p88_p11 = scmp.eq.s32.totalorder %s87_s26, 0  ;;  %s1917_s29 = sand.u32 (!%p168_p10), 1, %s1797_s13  }
  0x12   : > { %171 = sbr.rel (%p168_p10) target bundleno = 483 (0x1e3), region = 28  ;;  %s1400_s30 = sshll.u32 (!%p168_p10), %s1809_s16, 1 }
  0x13   : > { %s1914_s28 = scalar_select %p88_p11, %s1801_s14, %s90_s27  }
  0x14   : > { %s197_s4 = sadd.s32 (!%p168_p10), %s1805_s15, %s1400_s30  ;;  %s189_s10 = scalar_lea.vmem (!%p168_p10), [#allocation4], %s1917_s29 }
  0x15   : > { %s1401_s5 = sshll.u32 (!%p168_p10), %s197_s4, 6  ;;  %s195_s11 = scalar_lea.vmem (!%p168_p10), [#allocation6], %s1917_s29 }
  0x16   : > { %p199_p12 = scmp.lt.s32.totalorder (!%p168_p10), %s1401_s5, 255  ;;  %p1403_p13 = scmp.ne.s32.totalorder (!%p168_p10), %s1805_s15, 0 }
  0x19   : > { %s2335_s5 = smov (!%p199_p12, %s1401_s5), 255  ;;  %210 = sbr.rel (%p1403_p13) target bundleno = 32 (0x20), region = 32 }
  0x1a   : > { %s1402_s6 = sshll.u32 %s2335_s5, 2  ;;  %vm211_vm0 = vcmask (!%p1403_p13), 516096   ;;  %v1823_v0 = vmov (!%p1403_p13), 0.0  }
  0x1b   : > { %s1924_s9 = scalar_lea.vmem %s2315_s0, %s1402_s6  ;;  %212 = vst.msk [vmem:[#allocation2] sm:$0x1] (!%p1403_p13), %vm211_vm0, %v1823_v0  ;;  %213 = vst.msk [vmem:[#allocation3] sm:$0x1] (!%p1403_p13), %vm211_vm0, %v1823_v0 }
  0x20 PF: > { %v1659_v1 = vld [vmem:[%s2316_s1] sm:$0xff]   ;;  %vm550_vm1 = vcmask 1044480   ;;  %v1660_v2 = vld [vmem:[%s2316_s1 + $0x8] sm:$0x3f]   ;;  %vm551_vm2 = vcmask 1045504   ;;  %v1824_v3 = vmov 65535  }
  0x21   : > { %1509 = vmatprep.subr.bf16.mxu0 %v1659_v1  ;;  %1577 = vmatprep.subr.bf16.mxu1 %v1659_v1  ;;  %v552_v4 = vsel %vm550_vm1, 4294967295, %v1824_v3  ;;  %v1661_v5 = vld [vmem:[%s1924_s9] sm:$0xff]   ;;  %vm453_vm3 = vcmask 220160   ;;  %v1662_v8 = vld [vmem:[%s1924_s9 + $0x8] sm:$0xff]   ;;  %v1663_v9 = vld [vmem:[%s1924_s9 + $0x10] sm:$0xff]   ;;  %vm911_vm4 = vcmask 523264  }
  0x22   : > { %1510 = vmatpush3.bf16.msra.mxu0 %v1659_v1  ;;  %1579 = vmatpush3.bf16.msra.mxu1 %v1659_v1  ;;  %v553_v6 = vsel %vm551_vm2, %v552_v4, 0  ;;  %v1664_v10 = vld [vmem:[%s1924_s9 + $0x18] sm:$0xff]   ;;  %v1665_v11 = vld [vmem:[%s1924_s9 + $0x20] sm:$0xff]   ;;  %v1678_v13 = vld [vmem:[%s1924_s9 + $0x88] sm:$0xff]   ;;  %vm1046_vm5 = vcmask 516096   ;;  %p1470_p0 = scmp.ne.s32.totalorder %s1805_s15, 1 }
  0x23   : > { %v555_v7 = vand.u32 %v1660_v2, %v553_v6  ;;  %1513 = vmatprep.mubr.msk.bf16.mxu0 %vm453_vm3, %v1661_v5  ;;  %v1677_v12 = vld [vmem:[%s1924_s9 + $0x80] sm:$0xff]   ;;  %v1679_v14 = vld [vmem:[%s1924_s9 + $0x90] sm:$0xff]   ;;  %v1666_v15 = vld [vmem:[%s1924_s9 + $0x28] sm:$0xff]  }
  0x24   : > { %1545 = vmatprep.mubr.msk.bf16.mxu1 %vm453_vm3, %v1677_v12  ;;  %v1667_v16 = vld [vmem:[%s1924_s9 + $0x30] sm:$0xff]   ;;  %v1680_v17 = vld [vmem:[%s1924_s9 + $0x98] sm:$0xff]   ;;  %v1681_v18 = vld [vmem:[%s1924_s9 + $0xa0] sm:$0xff]  }
  0x25   : > { %1511 = vmatprep.subr.bf16.mxu0 %v555_v7  ;;  %1578 = vmatprep.subr.bf16.mxu1 %v555_v7  ;;  %v1668_v19 = vld [vmem:[%s1924_s9 + $0x38] sm:$0xff]   ;;  %v1669_v20 = vld [vmem:[%s1924_s9 + $0x40] sm:$0xff]   ;;  %v1682_v21 = vld [vmem:[%s1924_s9 + $0xa8] sm:$0xff]  }
  0x26   : > { %1512 = vmatpush3.bf16.msra.mxu0 %v555_v7  ;;  %1580 = vmatpush3.bf16.msra.mxu1 %v555_v7  ;;  %v1683_v22 = vld [vmem:[%s1924_s9 + $0xb0] sm:$0xff]   ;;  %v1670_v23 = vld [vmem:[%s1924_s9 + $0x48] sm:$0xff]   ;;  %v1684_v25 = vld [vmem:[%s1924_s9 + $0xb8] sm:$0xff]  }
  0x27   : > { %v1671_v24 = vld [vmem:[%s1924_s9 + $0x50] sm:$0xff]   ;;  %v1685_v26 = vld [vmem:[%s1924_s9 + $0xc0] sm:$0xff]   ;;  %v1672_v27 = vld [vmem:[%s1924_s9 + $0x58] sm:$0xff]  }
  0x28   : > { %v1673_v28 = vld [vmem:[%s1924_s9 + $0x60] sm:$0xff]   ;;  %v1686_v29 = vld [vmem:[%s1924_s9 + $0xc8] sm:$0xff]   ;;  %v1687_v30 = vld [vmem:[%s1924_s9 + $0xd0] sm:$0xff]  }
  0x29   : > { %1514 = vmatmul.mubr.msk.bf16.vlgmr.msra.gmra.mrb[0].mxu0 %vm453_vm3, %v1662_v8  ;;  %1546 = vmatmul.mubr.msk.bf16.vlgmr.msra.gmra.mrb[0].mxu1 %vm453_vm3, %v1678_v13  ;;  %v1674_v31 = vld [vmem:[%s1924_s9 + $0x68] sm:$0xff]   ;;  %v1675_v32 = vld [vmem:[%s1924_s9 + $0x70] sm:$0xff]   ;;  %v1688_v33 = vld [vmem:[%s1924_s9 + $0xd8] sm:$0xff]  }
  0x2a   : > { %1517 = vmatprep.mubr.msk.bf16.mxu0 %vm453_vm3, %v1663_v9  ;;  %1549 = vmatprep.mubr.msk.bf16.mxu1 %vm453_vm3, %v1679_v14  ;;  %v1689_v34 = vld [vmem:[%s1924_s9 + $0xe0] sm:$0xff]   ;;  %v1676_v35 = vld [vmem:[%s1924_s9 + $0x78] sm:$0xff]   ;;  %v1690_v36 = vld [vmem:[%s1924_s9 + $0xe8] sm:$0xff]  }
  0x2b   : > { %v1691_v37 = vld [vmem:[%s1924_s9 + $0xf0] sm:$0xff]   ;;  %v1692_v38 = vld [vmem:[%s1924_s9 + $0xf8] sm:$0xff]  }
  0x31   : > { %1518 = vmatmul.mubr.msk.bf16.gmra.mrb[4].mxu0 %vm453_vm3, %v1664_v10  ;;  %1550 = vmatmul.mubr.msk.bf16.gmra.mrb[4].mxu1 %vm453_vm3, %v1680_v17 }
  0x32   : > { %1521 = vmatprep.mubr.msk.bf16.mxu0 %vm453_vm3, %v1665_v11  ;;  %1553 = vmatprep.mubr.msk.bf16.mxu1 %vm453_vm3, %v1681_v18 }
  0x39   : > { %1522 = vmatmul.mubr.msk.bf16.gmra.mrb[8].mxu0 %vm453_vm3, %v1666_v15  ;;  %1554 = vmatmul.mubr.msk.bf16.gmra.mrb[8].mxu1 %vm453_vm3, %v1682_v21 }
  0x3a   : > { %1525 = vmatprep.mubr.msk.bf16.mxu0 %vm453_vm3, %v1667_v16  ;;  %1557 = vmatprep.mubr.msk.bf16.mxu1 %vm453_vm3, %v1683_v22 }
  0x41   : > { %1526 = vmatmul.mubr.msk.bf16.gmra.mrb[12].mxu0 %vm453_vm3, %v1668_v19  ;;  %1558 = vmatmul.mubr.msk.bf16.gmra.mrb[12].mxu1 %vm453_vm3, %v1684_v25 }
  0x42   : > { %1529 = vmatprep.mubr.msk.bf16.mxu0 %vm453_vm3, %v1669_v20  ;;  %1561 = vmatprep.mubr.msk.bf16.mxu1 %vm453_vm3, %v1685_v26 }
  0x49   : > { %1530 = vmatmul.mubr.msk.bf16.gmra.mrb[16].mxu0 %vm453_vm3, %v1670_v23  ;;  %1562 = vmatmul.mubr.msk.bf16.gmra.mrb[16].mxu1 %vm453_vm3, %v1686_v29 }
  0x4a   : > { %1533 = vmatprep.mubr.msk.bf16.mxu0 %vm453_vm3, %v1671_v24  ;;  %1565 = vmatprep.mubr.msk.bf16.mxu1 %vm453_vm3, %v1687_v30 }
  0x51   : > { %1534 = vmatmul.mubr.msk.bf16.gmra.mrb[20].mxu0 %vm453_vm3, %v1672_v27  ;;  %1566 = vmatmul.mubr.msk.bf16.gmra.mrb[20].mxu1 %vm453_vm3, %v1688_v33 }
  0x52   : > { %1537 = vmatprep.mubr.msk.bf16.mxu0 %vm453_vm3, %v1673_v28  ;;  %1569 = vmatprep.mubr.msk.bf16.mxu1 %vm453_vm3, %v1689_v34 }
  0x59   : > { %1538 = vmatmul.mubr.msk.bf16.gmra.mrb[24].mxu0 %vm453_vm3, %v1674_v31  ;;  %1570 = vmatmul.mubr.msk.bf16.gmra.mrb[24].mxu1 %vm453_vm3, %v1690_v36 }
  0x5a   : > { %1541 = vmatprep.mubr.msk.bf16.mxu0 %vm453_vm3, %v1675_v32  ;;  %1573 = vmatprep.mubr.msk.bf16.mxu1 %vm453_vm3, %v1691_v37 }
  0x61   : > { %1542 = vmatmul.mubr.msk.bf16.gmra.mrb[28].mxu0 %vm453_vm3, %v1676_v35  ;;  %1574 = vmatmul.mubr.msk.bf16.gmra.mrb[28].mxu1 %vm453_vm3, %v1692_v38 }
  0xfc   : > { %v1515_v39 = vpop.f32.mrb[0].mxu0  ;;  %v2006_v5 = vpop.f32.mrb[0].mxu1 }
  0xfd   : > { %v591_v40 = vpop.f32.mrb[1].mxu0  ;;  %v848_v41 = vmax.f32 %v1515_v39, 0.0  ;;  %v2010_v10 = vpop.f32.mrb[1].mxu1 }
  0xfe   : > { %v846_v42 = vmax.f32 %v591_v40, 0.0  ;;  %v1516_v43 = vpop.f32.mrb[2].mxu0  ;;  %v2012_v14 = vpop.f32.mrb[2].mxu1 }
  0xff   : > { %v594_v44 = vpop.f32.mrb[3].mxu0  ;;  %v849_v46 = vmax.f32 %v1516_v43, 0.0  ;;  %v1051_v48 = vmul.f32 %v848_v41, %v848_v41  ;;  %v915_v53 = vsel %vm911_vm4, %v848_v41, 0.0  ;;  %v2016_v17 = vpop.f32.mrb[3].mxu1 }
 0x100   : > { %v1049_v45 = vmul.f32 %v846_v42, %v846_v42  ;;  %v847_v47 = vmax.f32 %v594_v44, 0.0  ;;  %v912_v49 = vsel %vm911_vm4, %v846_v42, 0.0 }
 0x101   : > { %v1052_v55 = vmul.f32 %v849_v46, %v849_v46  ;;  %v1116_v61 = vsel %vm911_vm4, %v1051_v48, 0.0  ;;  %v917_v62 = vsel %vm911_vm4, %v849_v46, 0.0 }
 0x102   : > { %v913_v50 = vsel %vm911_vm4, %v847_v47, 0.0  ;;  %v1050_v51 = vmul.f32 %v847_v47, %v847_v47  ;;  %v1113_v54 = vsel %vm911_vm4, %v1049_v45, 0.0 }
 0x103   : > { %v914_v52 = vadd.f32 %v913_v50, %v912_v49  ;;  %v1118_v6 = vsel %vm911_vm4, %v1052_v55, 0.0 }
 0x104   : > { %v1114_v56 = vsel %vm911_vm4, %v1050_v51, 0.0  ;;  %v1519_v57 = vpop.f32.mrb[4].mxu0  ;;  %v2022_v36 = vpop.f32.mrb[4].mxu1 }
 0x105   : > { %v916_v58 = vadd.f32 %v915_v53, %v914_v52  ;;  %v1115_v59 = vadd.f32 %v1114_v56, %v1113_v54  ;;  %v607_v60 = vpop.f32.mrb[5].mxu0  ;;  %v852_v2 = vmax.f32 %v1519_v57, 0.0  ;;  %v2025_v41 = vpop.f32.mrb[5].mxu1 }
 0x106   : > { %v850_v63 = vmax.f32 %v607_v60, 0.0  ;;  %v1520_v0 = vpop.f32.mrb[6].mxu0  ;;  %v2028_v45 = vpop.f32.mrb[6].mxu1 }
 0x107   : > { %v1117_v1 = vadd.f32 %v1116_v61, %v1115_v59  ;;  %v918_v3 = vadd.f32 %v917_v62, %v916_v58  ;;  %v610_v4 = vpop.f32.mrb[7].mxu0  ;;  %v853_v13 = vmax.f32 %v1520_v0, 0.0  ;;  %v1055_v18 = vmul.f32 %v852_v2, %v852_v2  ;;  %v2032_v50 = vpop.f32.mrb[7].mxu1 }
 0x108   : > { %v919_v7 = vsel %vm911_vm4, %v850_v63, 0.0  ;;  %v1053_v8 = vmul.f32 %v850_v63, %v850_v63  ;;  %v851_v9 = vmax.f32 %v610_v4, 0.0  ;;  %v923_v22 = vsel %vm911_vm4, %v852_v2, 0.0 }
 0x109   : > { %v920_v11 = vadd.f32 %v919_v7, %v918_v3  ;;  %v1119_v12 = vadd.f32 %v1118_v6, %v1117_v1  ;;  %v1056_v24 = vmul.f32 %v853_v13, %v853_v13  ;;  %v925_v28 = vsel %vm911_vm4, %v853_v13, 0.0 }
 0x10a   : > { %v1120_v15 = vsel %vm911_vm4, %v1053_v8, 0.0  ;;  %v921_v16 = vsel %vm911_vm4, %v851_v9, 0.0  ;;  %v1054_v21 = vmul.f32 %v851_v9, %v851_v9  ;;  %v1124_v32 = vsel %vm911_vm4, %v1055_v18, 0.0 }
 0x10b   : > { %v1121_v19 = vadd.f32 %v1120_v15, %v1119_v12  ;;  %v922_v20 = vadd.f32 %v921_v16, %v920_v11  ;;  %v1126_v42 = vsel %vm911_vm4, %v1056_v24, 0.0 }
 0x10c   : > { %v1523_v23 = vpop.f32.mrb[8].mxu0  ;;  %v1122_v26 = vsel %vm911_vm4, %v1054_v21, 0.0  ;;  %v2038_v4 = vpop.f32.mrb[8].mxu1 }
 0x10d   : > { %v924_v25 = vadd.f32 %v923_v22, %v922_v20  ;;  %v623_v27 = vpop.f32.mrb[9].mxu0  ;;  %v1123_v29 = vadd.f32 %v1122_v26, %v1121_v19  ;;  %v856_v33 = vmax.f32 %v1523_v23, 0.0  ;;  %v2041_v11 = vpop.f32.mrb[9].mxu1 }
 0x10e   : > { %v854_v30 = vmax.f32 %v623_v27, 0.0  ;;  %v1524_v31 = vpop.f32.mrb[10].mxu0  ;;  %v2044_v16 = vpop.f32.mrb[10].mxu1 }
 0x10f   : > { %v926_v34 = vadd.f32 %v925_v28, %v924_v25  ;;  %v626_v35 = vpop.f32.mrb[11].mxu0  ;;  %v1125_v37 = vadd.f32 %v1124_v32, %v1123_v29  ;;  %v857_v44 = vmax.f32 %v1524_v31, 0.0  ;;  %v1059_v51 = vmul.f32 %v856_v33, %v856_v33  ;;  %v2048_v22 = vpop.f32.mrb[11].mxu1 }
 0x110   : > { %v927_v38 = vsel %vm911_vm4, %v854_v30, 0.0  ;;  %v1057_v39 = vmul.f32 %v854_v30, %v854_v30  ;;  %v855_v40 = vmax.f32 %v626_v35, 0.0  ;;  %v931_v53 = vsel %vm911_vm4, %v856_v33, 0.0 }
 0x111   : > { %v928_v43 = vadd.f32 %v927_v38, %v926_v34  ;;  %v1127_v46 = vadd.f32 %v1126_v42, %v1125_v37  ;;  %v1060_v57 = vmul.f32 %v857_v44, %v857_v44  ;;  %v933_v60 = vsel %vm911_vm4, %v857_v44, 0.0 }
 0x112   : > { %v1128_v47 = vsel %vm911_vm4, %v1057_v39, 0.0  ;;  %v929_v48 = vsel %vm911_vm4, %v855_v40, 0.0  ;;  %v1058_v49 = vmul.f32 %v855_v40, %v855_v40  ;;  %v1132_v0 = vsel %vm911_vm4, %v1059_v51, 0.0 }
 0x113   : > { %v930_v52 = vadd.f32 %v929_v48, %v928_v43  ;;  %v1129_v54 = vadd.f32 %v1128_v47, %v1127_v46  ;;  %v1134_v12 = vsel %vm911_vm4, %v1060_v57, 0.0 }
 0x114   : > { %v1130_v55 = vsel %vm911_vm4, %v1058_v49, 0.0  ;;  %v1527_v56 = vpop.f32.mrb[12].mxu0  ;;  %v2054_v42 = vpop.f32.mrb[12].mxu1 }
 0x115   : > { %v932_v58 = vadd.f32 %v931_v53, %v930_v52  ;;  %v639_v59 = vpop.f32.mrb[13].mxu0  ;;  %v1131_v61 = vadd.f32 %v1130_v55, %v1129_v54  ;;  %v860_v1 = vmax.f32 %v1527_v56, 0.0  ;;  %v2057_v48 = vpop.f32.mrb[13].mxu1 }
 0x116   : > { %v858_v62 = vmax.f32 %v639_v59, 0.0  ;;  %v1528_v63 = vpop.f32.mrb[14].mxu0  ;;  %v2060_v53 = vpop.f32.mrb[14].mxu1 }
 0x117   : > { %v934_v2 = vadd.f32 %v933_v60, %v932_v58  ;;  %v642_v3 = vpop.f32.mrb[15].mxu0  ;;  %v1133_v6 = vadd.f32 %v1132_v0, %v1131_v61  ;;  %v861_v15 = vmax.f32 %v1528_v63, 0.0  ;;  %v1063_v23 = vmul.f32 %v860_v1, %v860_v1  ;;  %v2064_v58 = vpop.f32.mrb[15].mxu1 }
 0x118   : > { %v935_v7 = vsel %vm911_vm4, %v858_v62, 0.0  ;;  %v1061_v8 = vmul.f32 %v858_v62, %v858_v62  ;;  %v859_v9 = vmax.f32 %v642_v3, 0.0  ;;  %v939_v25 = vsel %vm911_vm4, %v860_v1, 0.0 }
 0x119   : > { %v936_v13 = vadd.f32 %v935_v7, %v934_v2  ;;  %v1135_v18 = vadd.f32 %v1134_v12, %v1133_v6  ;;  %v1064_v29 = vmul.f32 %v861_v15, %v861_v15  ;;  %v941_v32 = vsel %vm911_vm4, %v861_v15, 0.0 }
 0x11a   : > { %v1136_v19 = vsel %vm911_vm4, %v1061_v8, 0.0  ;;  %v937_v20 = vsel %vm911_vm4, %v859_v9, 0.0  ;;  %v1062_v21 = vmul.f32 %v859_v9, %v859_v9  ;;  %v1140_v37 = vsel %vm911_vm4, %v1063_v23, 0.0 }
 0x11b   : > { %v938_v24 = vadd.f32 %v937_v20, %v936_v13  ;;  %v1137_v26 = vadd.f32 %v1136_v19, %v1135_v18  ;;  %v1142_v49 = vsel %vm911_vm4, %v1064_v29, 0.0 }
 0x11c   : > { %v1138_v27 = vsel %vm911_vm4, %v1062_v21, 0.0  ;;  %v1531_v28 = vpop.f32.mrb[16].mxu0  ;;  %v2070_v19 = vpop.f32.mrb[16].mxu1 }
 0x11d   : > { %v940_v30 = vadd.f32 %v939_v25, %v938_v24  ;;  %v655_v31 = vpop.f32.mrb[17].mxu0  ;;  %v1139_v33 = vadd.f32 %v1138_v27, %v1137_v26  ;;  %v864_v38 = vmax.f32 %v1531_v28, 0.0  ;;  %v2073_v25 = vpop.f32.mrb[17].mxu1 }
 0x11e   : > { %v862_v34 = vmax.f32 %v655_v31, 0.0  ;;  %v1532_v35 = vpop.f32.mrb[18].mxu0  ;;  %v2076_v29 = vpop.f32.mrb[18].mxu1 }
 0x11f   : > { %v942_v39 = vadd.f32 %v941_v32, %v940_v30  ;;  %v658_v40 = vpop.f32.mrb[19].mxu0  ;;  %v1141_v43 = vadd.f32 %v1140_v37, %v1139_v33  ;;  %v865_v52 = vmax.f32 %v1532_v35, 0.0  ;;  %v1067_v59 = vmul.f32 %v864_v38, %v864_v38 }
 0x120   : > { %v943_v44 = vsel %vm911_vm4, %v862_v34, 0.0  ;;  %v1065_v46 = vmul.f32 %v862_v34, %v862_v34  ;;  %v863_v47 = vmax.f32 %v658_v40, 0.0  ;;  %v947_v61 = vsel %vm911_vm4, %v864_v38, 0.0  ;;  %v2080_v34 = vpop.f32.mrb[19].mxu1 }
 0x121   : > { %v944_v51 = vadd.f32 %v943_v44, %v942_v39  ;;  %v1143_v54 = vadd.f32 %v1142_v49, %v1141_v43  ;;  %v1068_v1 = vmul.f32 %v865_v52, %v865_v52  ;;  %v949_v6 = vsel %vm911_vm4, %v865_v52, 0.0 }
 0x122   : > { %v1144_v55 = vsel %vm911_vm4, %v1065_v46, 0.0  ;;  %v945_v56 = vsel %vm911_vm4, %v863_v47, 0.0  ;;  %v1066_v57 = vmul.f32 %v863_v47, %v863_v47  ;;  %v1148_v12 = vsel %vm911_vm4, %v1067_v59, 0.0 }
 0x123   : > { %v946_v60 = vadd.f32 %v945_v56, %v944_v51  ;;  %v1145_v62 = vadd.f32 %v1144_v55, %v1143_v54  ;;  %v1150_v26 = vsel %vm911_vm4, %v1068_v1, 0.0 }
 0x124   : > { %v1146_v63 = vsel %vm911_vm4, %v1066_v57, 0.0  ;;  %v1535_v0 = vpop.f32.mrb[20].mxu0 }
 0x125   : > { %v948_v2 = vadd.f32 %v947_v61, %v946_v60  ;;  %v671_v3 = vpop.f32.mrb[21].mxu0  ;;  %v1147_v7 = vadd.f32 %v1146_v63, %v1145_v62  ;;  %v868_v13 = vmax.f32 %v1535_v0, 0.0  ;;  %v2086_v60 = vpop.f32.mrb[20].mxu1 }
 0x126   : > { %v866_v8 = vmax.f32 %v671_v3, 0.0  ;;  %v1536_v9 = vpop.f32.mrb[22].mxu0  ;;  %v2089_v1 = vpop.f32.mrb[21].mxu1 }
 0x127   : > { %v950_v15 = vadd.f32 %v949_v6, %v948_v2  ;;  %v674_v18 = vpop.f32.mrb[23].mxu0  ;;  %v1149_v20 = vadd.f32 %v1148_v12, %v1147_v7  ;;  %v869_v28 = vmax.f32 %v1536_v9, 0.0  ;;  %v1071_v35 = vmul.f32 %v868_v13, %v868_v13  ;;  %v2092_v7 = vpop.f32.mrb[22].mxu1 }
 0x128   : > { %v951_v21 = vsel %vm911_vm4, %v866_v8, 0.0  ;;  %v1069_v23 = vmul.f32 %v866_v8, %v866_v8  ;;  %v867_v24 = vmax.f32 %v674_v18, 0.0  ;;  %v955_v38 = vsel %vm911_vm4, %v868_v13, 0.0 }
 0x129   : > { %v952_v27 = vadd.f32 %v951_v21, %v950_v15  ;;  %v1151_v30 = vadd.f32 %v1150_v26, %v1149_v20  ;;  %v1072_v44 = vmul.f32 %v869_v28, %v869_v28  ;;  %v957_v49 = vsel %vm911_vm4, %v869_v28, 0.0  ;;  %v2096_v15 = vpop.f32.mrb[23].mxu1 }
 0x12a   : > { %v1152_v31 = vsel %vm911_vm4, %v1069_v23, 0.0  ;;  %v953_v32 = vsel %vm911_vm4, %v867_v24, 0.0  ;;  %v1070_v33 = vmul.f32 %v867_v24, %v867_v24  ;;  %v1156_v55 = vsel %vm911_vm4, %v1071_v35, 0.0 }
 0x12b   : > { %v954_v37 = vadd.f32 %v953_v32, %v952_v27  ;;  %v1153_v39 = vadd.f32 %v1152_v31, %v1151_v30  ;;  %v1158_v2 = vsel %vm911_vm4, %v1072_v44, 0.0 }
 0x12c   : > { %v1154_v40 = vsel %vm911_vm4, %v1070_v33, 0.0  ;;  %v1539_v43 = vpop.f32.mrb[24].mxu0  ;;  %v2103_v44 = vpop.f32.mrb[24].mxu1 }
 0x12d   : > { %v956_v46 = vadd.f32 %v955_v38, %v954_v37  ;;  %v687_v47 = vpop.f32.mrb[25].mxu0  ;;  %v1155_v51 = vadd.f32 %v1154_v40, %v1153_v39  ;;  %v872_v56 = vmax.f32 %v1539_v43, 0.0  ;;  %v878_v43 = vmax.f32 %v2010_v10, 0.0 }
 0x12e   : > { %v870_v52 = vmax.f32 %v687_v47, 0.0  ;;  %v1540_v54 = vpop.f32.mrb[26].mxu0 }
 0x12f   : > { %v958_v57 = vadd.f32 %v957_v49, %v956_v46  ;;  %v690_v59 = vpop.f32.mrb[27].mxu0  ;;  %v1157_v61 = vadd.f32 %v1156_v55, %v1155_v51  ;;  %v873_v6 = vmax.f32 %v1540_v54, 0.0  ;;  %v1075_v18 = vmul.f32 %v872_v56, %v872_v56 }
 0x130   : > { %v959_v62 = vsel %vm911_vm4, %v870_v52, 0.0  ;;  %v1073_v63 = vmul.f32 %v870_v52, %v870_v52  ;;  %v871_v0 = vmax.f32 %v690_v59, 0.0  ;;  %v963_v21 = vsel %vm911_vm4, %v872_v56, 0.0  ;;  %v2106_v52 = vpop.f32.mrb[25].mxu1 }
 0x131   : > { %v960_v3 = vadd.f32 %v959_v62, %v958_v57  ;;  %v1159_v8 = vadd.f32 %v1158_v2, %v1157_v61  ;;  %v1076_v27 = vmul.f32 %v873_v6, %v873_v6  ;;  %v965_v31 = vsel %vm911_vm4, %v873_v6, 0.0  ;;  %v2109_v57 = vpop.f32.mrb[26].mxu1 }
 0x132   : > { %v1160_v9 = vsel %vm911_vm4, %v1073_v63, 0.0  ;;  %v961_v12 = vsel %vm911_vm4, %v871_v0, 0.0  ;;  %v1074_v13 = vmul.f32 %v871_v0, %v871_v0  ;;  %v1164_v37 = vsel %vm911_vm4, %v1075_v18, 0.0  ;;  %v2113_v63 = vpop.f32.mrb[27].mxu1 }
 0x133   : > { %v962_v20 = vadd.f32 %v961_v12, %v960_v3  ;;  %v1161_v23 = vadd.f32 %v1160_v9, %v1159_v8  ;;  %v1166_v54 = vsel %vm911_vm4, %v1076_v27, 0.0  ;;  %v1081_v9 = vmul.f32 %v878_v43, %v878_v43 }
 0x134   : > { %v1162_v24 = vsel %vm911_vm4, %v1074_v13, 0.0  ;;  %v1543_v26 = vpop.f32.mrb[28].mxu0  ;;  %v879_v18 = vmax.f32 %v2016_v17, 0.0 }
 0x135   : > { %v964_v28 = vadd.f32 %v963_v21, %v962_v20  ;;  %v703_v30 = vpop.f32.mrb[29].mxu0  ;;  %v1163_v32 = vadd.f32 %v1162_v24, %v1161_v23  ;;  %v876_v38 = vmax.f32 %v1543_v26, 0.0  ;;  %v975_v23 = vsel %vm911_vm4, %v878_v43, 0.0 }
 0x136   : > { %v874_v33 = vmax.f32 %v703_v30, 0.0  ;;  %v1544_v35 = vpop.f32.mrb[30].mxu0  ;;  %v880_v26 = vmax.f32 %v2006_v5, 0.0  ;;  %v977_v5 = vsel %vm911_vm4, %v879_v18, 0.0 }
 0x137   : > { %v966_v39 = vadd.f32 %v965_v31, %v964_v28  ;;  %v706_v40 = vpop.f32.mrb[31].mxu0  ;;  %v1165_v46 = vadd.f32 %v1164_v37, %v1163_v32  ;;  %v877_v56 = vmax.f32 %v1544_v35, 0.0  ;;  %v1079_v0 = vmul.f32 %v876_v38, %v876_v38  ;;  %v2122_v28 = vpop.f32.mrb[28].mxu1 }
 0x138   : > { %v967_v47 = vsel %vm911_vm4, %v874_v33, 0.0  ;;  %v1077_v49 = vmul.f32 %v874_v33, %v874_v33  ;;  %v875_v51 = vmax.f32 %v706_v40, 0.0  ;;  %v971_v3 = vsel %vm911_vm4, %v876_v38, 0.0  ;;  %v2126_v33 = vpop.f32.mrb[29].mxu1 }
 0x139   : > { %v968_v55 = vadd.f32 %v967_v47, %v966_v39  ;;  %v1167_v59 = vadd.f32 %v1166_v54, %v1165_v46  ;;  %v1080_v12 = vmul.f32 %v877_v56, %v877_v56  ;;  %v973_v20 = vsel %vm911_vm4, %v877_v56, 0.0  ;;  %v2130_v39 = vpop.f32.mrb[30].mxu1 }
 0x13a   : > { %v1168_v61 = vsel %vm911_vm4, %v1077_v49, 0.0  ;;  %v969_v10 = vsel %vm911_vm4, %v875_v51, 0.0  ;;  %v1078_v62 = vmul.f32 %v875_v51, %v875_v51  ;;  %v1172_v24 = vsel %vm911_vm4, %v1079_v0, 0.0  ;;  %v2133_v43 = vpop.f32.mrb[31].mxu1 }
 0x13b   : > { %v970_v2 = vadd.f32 %v969_v10, %v968_v55  ;;  %v1169_v6 = vadd.f32 %v1168_v61, %v1167_v59  ;;  %v1176_v31 = vsel %vm911_vm4, %v1081_v9, 0.0  ;;  %v881_v32 = vmax.f32 %v2012_v14, 0.0 }
 0x13c   : > { %v1170_v8 = vsel %vm911_vm4, %v1078_v62, 0.0  ;;  %v1174_v17 = vsel %vm911_vm4, %v1080_v12, 0.0  ;;  %v1082_v37 = vmul.f32 %v879_v18, %v879_v18  ;;  %v882_v38 = vmax.f32 %v2025_v41, 0.0 }
 0x13d   : > { %v972_v13 = vadd.f32 %v971_v3, %v970_v2  ;;  %v1171_v21 = vadd.f32 %v1170_v8, %v1169_v6  ;;  %v1083_v46 = vmul.f32 %v880_v26, %v880_v26  ;;  %v979_v49 = vsel %vm911_vm4, %v880_v26, 0.0 }
 0x13e   : > { %v1084_v51 = vmul.f32 %v881_v32, %v881_v32  ;;  %v1178_v55 = vsel %vm911_vm4, %v1082_v37, 0.0  ;;  %v1085_v56 = vmul.f32 %v882_v38, %v882_v38  ;;  %v883_v59 = vmax.f32 %v2032_v50, 0.0 }
 0x13f   : > { %v974_v27 = vadd.f32 %v973_v20, %v972_v13  ;;  %v1173_v30 = vadd.f32 %v1172_v24, %v1171_v21  ;;  %v981_v41 = vsel %vm911_vm4, %v881_v32, 0.0  ;;  %v983_v10 = vsel %vm911_vm4, %v882_v38, 0.0 }
 0x140   : > { %v1180_v62 = vsel %vm911_vm4, %v1083_v46, 0.0  ;;  %v884_v0 = vmax.f32 %v2022_v36, 0.0  ;;  %v1182_v3 = vsel %vm911_vm4, %v1084_v51, 0.0  ;;  %v885_v8 = vmax.f32 %v2028_v45, 0.0 }
 0x141   : > { %v976_v35 = vadd.f32 %v975_v23, %v974_v27  ;;  %v1175_v40 = vadd.f32 %v1174_v17, %v1173_v30  ;;  %v1184_v12 = vsel %vm911_vm4, %v1085_v56, 0.0  ;;  %v1086_v13 = vmul.f32 %v883_v59, %v883_v59 }
 0x142   : > { %v886_v50 = vmax.f32 %v2041_v11, 0.0  ;;  %v985_v20 = vsel %vm911_vm4, %v883_v59, 0.0  ;;  %v1087_v21 = vmul.f32 %v884_v0, %v884_v0  ;;  %v987_v24 = vsel %vm911_vm4, %v884_v0, 0.0 }
 0x143   : > { %v978_v47 = vadd.f32 %v977_v5, %v976_v35  ;;  %v1177_v14 = vadd.f32 %v1176_v31, %v1175_v40  ;;  %v1088_v26 = vmul.f32 %v885_v8, %v885_v8  ;;  %v1186_v30 = vsel %vm911_vm4, %v1086_v13, 0.0 }
 0x144   : > { %v1089_v31 = vmul.f32 %v886_v50, %v886_v50  ;;  %v887_v45 = vmax.f32 %v2048_v22, 0.0  ;;  %v989_v32 = vsel %vm911_vm4, %v885_v8, 0.0  ;;  %v991_v11 = vsel %vm911_vm4, %v886_v50, 0.0 }
 0x145   : > { %v980_v54 = vadd.f32 %v979_v49, %v978_v47  ;;  %v1179_v61 = vadd.f32 %v1178_v55, %v1177_v14  ;;  %v1188_v35 = vsel %vm911_vm4, %v1087_v21, 0.0  ;;  %v888_v37 = vmax.f32 %v2038_v4, 0.0 }
 0x146   : > { %v1190_v40 = vsel %vm911_vm4, %v1088_v26, 0.0  ;;  %v889_v46 = vmax.f32 %v2044_v16, 0.0  ;;  %v1192_v49 = vsel %vm911_vm4, %v1089_v31, 0.0  ;;  %v1090_v14 = vmul.f32 %v887_v45, %v887_v45 }
 0x147   : > { %v982_v2 = vadd.f32 %v981_v41, %v980_v54  ;;  %v1181_v6 = vadd.f32 %v1180_v62, %v1179_v61  ;;  %v890_v22 = vmax.f32 %v2057_v48, 0.0  ;;  %v993_v54 = vsel %vm911_vm4, %v887_v45, 0.0 }
 0x148   : > { %v1091_v55 = vmul.f32 %v888_v37, %v888_v37  ;;  %v995_v59 = vsel %vm911_vm4, %v888_v37, 0.0  ;;  %v1092_v41 = vmul.f32 %v889_v46, %v889_v46  ;;  %v891_v16 = vmax.f32 %v2064_v58, 0.0 }
 0x149   : > { %v984_v9 = vadd.f32 %v983_v10, %v982_v2  ;;  %v1183_v18 = vadd.f32 %v1182_v3, %v1181_v6  ;;  %v1194_v10 = vsel %vm911_vm4, %v1090_v14, 0.0  ;;  %v1093_v62 = vmul.f32 %v890_v22, %v890_v22 }
 0x14a   : > { %v997_v0 = vsel %vm911_vm4, %v889_v46, 0.0  ;;  %v999_v48 = vsel %vm911_vm4, %v890_v22, 0.0  ;;  %v1196_v3 = vsel %vm911_vm4, %v1091_v55, 0.0  ;;  %v892_v6 = vmax.f32 %v2054_v42, 0.0 }
 0x14b   : > { %v986_v23 = vadd.f32 %v985_v20, %v984_v9  ;;  %v1185_v36 = vadd.f32 %v1184_v12, %v1183_v18  ;;  %v1198_v9 = vsel %vm911_vm4, %v1092_v41, 0.0  ;;  %v893_v13 = vmax.f32 %v2060_v53, 0.0 }
 0x14c   : > { %v1200_v18 = vsel %vm911_vm4, %v1093_v62, 0.0  ;;  %v1094_v20 = vmul.f32 %v891_v16, %v891_v16  ;;  %v894_v58 = vmax.f32 %v2073_v25, 0.0  ;;  %v1003_v26 = vsel %vm911_vm4, %v892_v6, 0.0 }
 0x14d   : > { %v988_v27 = vadd.f32 %v987_v24, %v986_v23  ;;  %v1187_v17 = vadd.f32 %v1186_v30, %v1185_v36  ;;  %v1001_v23 = vsel %vm911_vm4, %v891_v16, 0.0  ;;  %v1095_v24 = vmul.f32 %v892_v6, %v892_v6 }
 0x14e   : > { %v1202_v31 = vsel %vm911_vm4, %v1094_v20, 0.0  ;;  %v1097_v45 = vmul.f32 %v894_v58, %v894_v58  ;;  %v895_v53 = vmax.f32 %v2080_v34, 0.0  ;;  %v1007_v25 = vsel %vm911_vm4, %v894_v58, 0.0 }
 0x14f   : > { %v990_v38 = vadd.f32 %v989_v32, %v988_v27  ;;  %v1189_v5 = vadd.f32 %v1188_v35, %v1187_v17  ;;  %v1096_v27 = vmul.f32 %v893_v13, %v893_v13  ;;  %v1005_v32 = vsel %vm911_vm4, %v893_v13, 0.0 }
 0x150   : > { %v896_v35 = vmax.f32 %v2070_v19, 0.0  ;;  %v898_v34 = vmax.f32 %v2089_v1, 0.0  ;;  %v1009_v22 = vsel %vm911_vm4, %v895_v53, 0.0  ;;  %v900_v16 = vmax.f32 %v2086_v60, 0.0 }
 0x151   : > { %v992_v47 = vadd.f32 %v991_v11, %v990_v38  ;;  %v1191_v51 = vadd.f32 %v1190_v40, %v1189_v5  ;;  %v1204_v11 = vsel %vm911_vm4, %v1095_v24, 0.0  ;;  %v1206_v38 = vsel %vm911_vm4, %v1096_v27, 0.0 }
 0x152   : > { %v897_v5 = vmax.f32 %v2076_v29, 0.0  ;;  %v1011_v55 = vsel %vm911_vm4, %v896_v35, 0.0  ;;  %v1101_v41 = vmul.f32 %v898_v34, %v898_v34  ;;  %v899_v29 = vmax.f32 %v2096_v15, 0.0 }
 0x153   : > { %v994_v56 = vadd.f32 %v993_v54, %v992_v47  ;;  %v1193_v4 = vadd.f32 %v1192_v49, %v1191_v51  ;;  %v1208_v47 = vsel %vm911_vm4, %v1097_v45, 0.0  ;;  %v1098_v49 = vmul.f32 %v895_v53, %v895_v53 }
 0x154   : > { %v1099_v51 = vmul.f32 %v896_v35, %v896_v35  ;;  %v1015_v1 = vsel %vm911_vm4, %v898_v34, 0.0  ;;  %v902_v15 = vmax.f32 %v2106_v52, 0.0  ;;  %v1017_v13 = vsel %vm911_vm4, %v899_v29, 0.0 }
 0x155   : > { %v996_v61 = vadd.f32 %v995_v59, %v994_v56  ;;  %v1195_v2 = vadd.f32 %v1194_v10, %v1193_v4  ;;  %v1100_v56 = vmul.f32 %v897_v5, %v897_v5  ;;  %v1210_v4 = vsel %vm911_vm4, %v1098_v49, 0.0 }
 0x156   : > { %v1212_v62 = vsel %vm911_vm4, %v1099_v51, 0.0  ;;  %v1019_v20 = vsel %vm911_vm4, %v900_v16, 0.0  ;;  %v1105_v24 = vmul.f32 %v902_v15, %v902_v15  ;;  %v1023_v52 = vsel %vm911_vm4, %v902_v15, 0.0 }
 0x157   : > { %v998_v8 = vadd.f32 %v997_v0, %v996_v61  ;;  %v1197_v12 = vadd.f32 %v1196_v3, %v1195_v2  ;;  %v1013_v61 = vsel %vm911_vm4, %v897_v5, 0.0  ;;  %v1214_v2 = vsel %vm911_vm4, %v1100_v56, 0.0 }
 0x158   : > { %v901_v3 = vmax.f32 %v2092_v7, 0.0  ;;  %v903_v7 = vmax.f32 %v2113_v63, 0.0  ;;  %v904_v27 = vmax.f32 %v2103_v44, 0.0  ;;  %v905_v53 = vmax.f32 %v2109_v57, 0.0 }
 0x159   : > { %v1000_v50 = vadd.f32 %v999_v48, %v998_v8  ;;  %v1199_v21 = vadd.f32 %v1198_v9, %v1197_v12  ;;  %v1216_v8 = vsel %vm911_vm4, %v1101_v41, 0.0  ;;  %v1102_v9 = vmul.f32 %v899_v29, %v899_v29 }
 0x15a   : > { %v1104_v58 = vmul.f32 %v901_v3, %v901_v3  ;;  %v906_v63 = vmax.f32 %v2126_v33, 0.0  ;;  %v1025_v35 = vsel %vm911_vm4, %v903_v7, 0.0  ;;  %v1108_v5 = vmul.f32 %v905_v53, %v905_v53 }
 0x15b   : > { %v1002_v36 = vadd.f32 %v1001_v23, %v1000_v50  ;;  %v1201_v42 = vadd.f32 %v1200_v18, %v1199_v21  ;;  %v1103_v50 = vmul.f32 %v900_v16, %v900_v16  ;;  %v1218_v23 = vsel %vm911_vm4, %v1102_v9, 0.0 }
 0x15c   : > { %v1109_v49 = vmul.f32 %v906_v63, %v906_v63  ;;  %v907_v57 = vmax.f32 %v2133_v43, 0.0  ;;  %v1029_v34 = vsel %vm911_vm4, %v905_v53, 0.0  ;;  %v1031_v33 = vsel %vm911_vm4, %v906_v63, 0.0 }
 0x15d   : > { %v1004_v30 = vadd.f32 %v1003_v26, %v1002_v36  ;;  %v1203_v17 = vadd.f32 %v1202_v31, %v1201_v42  ;;  %v1021_v36 = vsel %vm911_vm4, %v901_v3, 0.0  ;;  %v1220_v42 = vsel %vm911_vm4, %v1103_v50, 0.0 }
 0x15e   : > { %v1222_v31 = vsel %vm911_vm4, %v1104_v58, 0.0  ;;  %v908_v51 = vmax.f32 %v2122_v28, 0.0  ;;  %v1110_v41 = vmul.f32 %v907_v57, %v907_v57  ;;  %v1033_v29 = vsel %vm911_vm4, %v907_v57, 0.0 }
 0x15f   : > { %v1006_v37 = vadd.f32 %v1005_v32, %v1004_v30  ;;  %v1205_v40 = vadd.f32 %v1204_v11, %v1203_v17  ;;  %v1224_v17 = vsel %vm911_vm4, %v1105_v24, 0.0 }
 0x161   : > { %v1008_v46 = vadd.f32 %v1007_v25, %v1006_v37  ;;  %v1207_v14 = vadd.f32 %v1206_v38, %v1205_v40  ;;  %v1106_v25 = vmul.f32 %v903_v7, %v903_v7  ;;  %v1107_v37 = vmul.f32 %v904_v27, %v904_v27 }
 0x162   : > { %v1027_v40 = vsel %vm911_vm4, %v904_v27, 0.0 }
 0x163   : > { %v1010_v54 = vadd.f32 %v1009_v22, %v1008_v46  ;;  %v1209_v19 = vadd.f32 %v1208_v47, %v1207_v14  ;;  %v1226_v47 = vsel %vm911_vm4, %v1106_v25, 0.0  ;;  %v1228_v22 = vsel %vm911_vm4, %v1107_v37, 0.0 }
 0x165   : > { %v1012_v59 = vadd.f32 %v1011_v55, %v1010_v54  ;;  %v1211_v10 = vadd.f32 %v1210_v4, %v1209_v19  ;;  %v1230_v55 = vsel %vm911_vm4, %v1108_v5, 0.0  ;;  %v909_v4 = vmax.f32 %v2130_v39, 0.0 }
 0x167   : > { %v1014_v0 = vadd.f32 %v1013_v61, %v1012_v59  ;;  %v1213_v48 = vadd.f32 %v1212_v62, %v1211_v10  ;;  %v1232_v59 = vsel %vm911_vm4, %v1109_v49, 0.0  ;;  %v1111_v61 = vmul.f32 %v908_v51, %v908_v51 }
 0x168   : > { %v1112_v16 = vmul.f32 %v909_v4, %v909_v4 }
 0x169   : > { %v1016_v6 = vadd.f32 %v1015_v1, %v1014_v0  ;;  %v1215_v12 = vadd.f32 %v1214_v2, %v1213_v48  ;;  %v1035_v1 = vsel %vm911_vm4, %v908_v51, 0.0  ;;  %v1234_v0 = vsel %vm911_vm4, %v1110_v41, 0.0 }
 0x16a   : > { %v1037_v2 = vsel %vm911_vm4, %v909_v4, 0.0  ;;  %v1236_v3 = vsel %vm911_vm4, %v1111_v61, 0.0 }
 0x16b   : > { %v1018_v18 = vadd.f32 %v1017_v13, %v1016_v6  ;;  %v1217_v60 = vadd.f32 %v1216_v8, %v1215_v12  ;;  %v1238_v8 = vsel %vm911_vm4, %v1112_v16, 0.0 }
 0x16d   : > { %v1020_v21 = vadd.f32 %v1019_v20, %v1018_v18  ;;  %v1219_v26 = vadd.f32 %v1218_v23, %v1217_v60 }
 0x16f   : > { %v1022_v30 = vadd.f32 %v1021_v36, %v1020_v21  ;;  %v1221_v45 = vadd.f32 %v1220_v42, %v1219_v26  ;;  %v910_v21 = vld [vmem:[#allocation2] sm:$0x1]  ;;  %v1048_v26 = vld [vmem:[#allocation3] sm:$0x1] }
 0x171   : > { %v1024_v32 = vadd.f32 %v1023_v52, %v1022_v30  ;;  %v1223_v11 = vadd.f32 %v1222_v31, %v1221_v45 }
 0x173   : > { %v1026_v38 = vadd.f32 %v1025_v35, %v1024_v32  ;;  %v1225_v44 = vadd.f32 %v1224_v17, %v1223_v11 }
 0x175   : > { %v1028_v46 = vadd.f32 %v1027_v40, %v1026_v38  ;;  %v1227_v14 = vadd.f32 %v1226_v47, %v1225_v44 }
 0x177   : > { %v1030_v54 = vadd.f32 %v1029_v34, %v1028_v46  ;;  %v1229_v19 = vadd.f32 %v1228_v22, %v1227_v14 }
 0x179   : > { %v1032_v56 = vadd.f32 %v1031_v33, %v1030_v54  ;;  %v1231_v43 = vadd.f32 %v1230_v55, %v1229_v19 }
 0x17b   : > { %v1034_v10 = vadd.f32 %v1033_v29, %v1032_v56  ;;  %v1233_v62 = vadd.f32 %v1232_v59, %v1231_v43 }
 0x17d   : > { %v1036_v28 = vadd.f32 %v1035_v1, %v1034_v10  ;;  %v1235_v48 = vadd.f32 %v1234_v0, %v1233_v62 }
 0x17f   : > { %v1038_v6 = vadd.f32 %v1037_v2, %v1036_v28  ;;  %v1237_v39 = vadd.f32 %v1236_v3, %v1235_v48 }
 0x181   : > { %v1039_v9 = vrot.slane %v1038_v6, 4  ;;  %v1239_v15 = vadd.f32 %v1238_v8, %v1237_v39 }
 0x183   : > { %v1040_v12 = vadd.f32 %v1039_v9, %v1038_v6  ;;  %v1240_v13 = vrot.slane %v1239_v15, 4 }
 0x185   : > { %v1041_v50 = vrot.slane %v1040_v12, 2  ;;  %v1241_v18 = vadd.f32 %v1240_v13, %v1239_v15 }
 0x187   : > { %v1042_v20 = vadd.f32 %v1041_v50, %v1040_v12  ;;  %v1242_v60 = vrot.slane %v1241_v18, 2 }
 0x189   : > { %v1043_v58 = vrot.slane %v1042_v20, 1  ;;  %v1243_v23 = vadd.f32 %v1242_v60, %v1241_v18 }
 0x18b   : > { %v1044_v24 = vadd.f32 %v1043_v58, %v1042_v20  ;;  %v1244_v7 = vrot.slane %v1243_v23, 1  ;;  %1251 = sbr.rel (%p1470_p0) target bundleno = 435 (0x1b3), region = 36 }
 0x18d   : > { %v1045_v36 = vadd.f32 %v1044_v24, %v910_v21  ;;  %v1245_v52 = vadd.f32 %v1244_v7, %v1243_v23 }
 0x18f   : > { %1047 = vst.msk [vmem:[#allocation2] sm:$0x1] %vm1046_vm5, %v1045_v36  ;;  %v1246_v42 = vadd.f32 %v1245_v52, %v1048_v26 }
 0x191   : > { %1247 = vst.msk [vmem:[#allocation3] sm:$0x1] %vm1046_vm5, %v1246_v42 }
 0x196   : > { %v1252_v27 = vld [vmem:[#allocation2] sm:$0x1] }
 0x197   : > { %v1253_v30 = vmul.f32 0.0009765625, %v1252_v27 }
 0x198   : > { %v1254_v45 = vld [vmem:[#allocation3] sm:$0x1] }
 0x199   : > { %v1255_v31 = vmul.f32 1024.0, %v1253_v30  ;;  %1260 = vst.msk [vmem:[%s189_s10] sm:$0x1] %vm1046_vm5, %v1253_v30 }
 0x19b   : > { %v1256_v53 = vmul.f32 %v1255_v31, %v1253_v30 }
 0x19d   : > { %v1257_v32 = vsub.f32 %v1254_v45, %v1256_v53 }
 0x19f   : > { %v1258_v17 = vmax.f32 %v1257_v32, 0.0 }
 0x1a1   : > { %v1259_v25 = vmul.f32 0.0009775171, %v1258_v17 }
 0x1a3   : > { %1693 = vrsqrt.f32 %v1259_v25  ;;  %vm1263_vm6 = vcmp.eq.f32.partialorder %v1259_v25, inf  ;;  %v1266_v11 = vand.u32 2147483648, %v1259_v25  ;;  %vm1265_vm7 = vcmp.eq.f32.partialorder %v1259_v25, 0.0 }
 0x1ad   : > { %v1694_v63 = vpop.eup %1693 }
 0x1ae   : > { %v1262_v35 = vmul.f32 %v1694_v63, %v1259_v25 }
 0x1b0   : > { %v1264_v37 = vsel %vm1263_vm6, %v1259_v25, %v1262_v35 }
 0x1b1   : > { %v1267_v38 = vsel %vm1265_vm7, %v1266_v11, %v1264_v37 }
 0x1b2   : > { %1268 = vst.msk [vmem:[%s195_s11] sm:$0x1] %vm1046_vm5, %v1267_v38 }
 0x1b3 PF: > { %s1471_s15 = sshll.u32 %s1809_s16, 4  ;;  %s1286_s6 = sshll.u32 %s189_s10, 4  ;;  %s1287_s6 = int_to_ptr.vmem [resolvable:$true] %s1286_s6 }
 0x1b4   : > { %s2238_s5 = scalar_lea.hbm %s2317_s2, %s1471_s15  ;;  %s1270_s7 = scalar_lea.sflag [#allocation5], %s1917_s29 }
 0x1b5   : > { %s1695_s8 = scalar_lea.vmem %s1287_s6, 16  ;;  %s1825_s9 = smov [#allocation4]  }
 0x1b6   : > { %p1696_p1 = scmp.ne.s32.totalorder %s1287_s6, %s1695_s8  ;;  %s1699_s20 = sshll.u32 %s1825_s9, 4  ;;  %s1700_s20 = int_to_ptr.vmem [resolvable:$false] %s1699_s20 }
 0x1b7   : > { %s1701_s21 = scalar_lea.vmem %s1700_s20, 32  ;;  %p1702_p5 = scmp.lt.s32.totalorder %s1287_s6, %s1700_s20 }
 0x1b8   : > { %p1697_p2 = pnand %p1696_p1, %p1896_p3  ;;  %p1703_p6 = scmp.lt.s32.totalorder %s1701_s21, %s1695_s8 }
 0x1ba   : > { %p1698_p4 = pneg %p1697_p2  ;;  %p1704_p7 = por %p1703_p6, %p1702_p5 }
 0x1bc   : > { %p1705_p8 = pnand %p1704_p7, %p1698_p4 }
 0x1be   : > { %1708 = shalt.err (!%p1705_p8)
}
 0x1bf   : > { %s1709_s10 = scalar_lea.hbm %s2238_s5, 16  ;;  %s1713_s30 = scalar_lea.hbm %s2317_s2, 32 }
 0x1c0   : > { %p1710_p10 = scmp.ne.s32.totalorder %s2238_s5, %s1709_s10  ;;  %p1714_p13 = scmp.lt.u32.totalorder %s2238_s5, %s2317_s2 }
 0x1c1   : > { %p1715_p0 = scmp.lt.u32.totalorder %s1713_s30, %s1709_s10  ;;  %p1717_p2 = scmp.lt.u32.totalorder %s1709_s10, %s2238_s5 }
 0x1c2   : > { %p1711_p11 = pnand %p1710_p10, %p1896_p3 }
 0x1c3   : > { %p1716_p1 = por %p1715_p0, %p1714_p13 }
 0x1c4   : > { %p1712_p12 = pneg %p1711_p11 }
 0x1c5   : > { %p1718_p4 = por %p1717_p2, %p1716_p1 }
 0x1c7   : > { %p1719_p5 = pnand %p1718_p4, %p1712_p12 }
 0x1c9   : > { %1722 = shalt.err (!%p1719_p5)
}
 0x1ca   : > { %1581 = dma.vmem_to_hbm [thread:$0]  (%p1896_p3), %s1287_s6, 16, %s2238_s5, %s1270_s7  }
 0x1cb   : > { %s2265_s21 = scalar_lea.hbm %s2318_s3, %s1471_s15  ;;  %s1299_s26 = sshll.u32 %s195_s11, 4  ;;  %s1300_s26 = int_to_ptr.vmem [resolvable:$true] %s1299_s26 }
 0x1cc   : > { %s1274_s10 = scalar_lea.sflag [#allocation7], %s1917_s29  ;;  %s1723_s27 = scalar_lea.vmem %s1300_s26, 16 }
 0x1cd   : > { %p1724_p6 = scmp.ne.s32.totalorder %s1300_s26, %s1723_s27  ;;  %s1826_s30 = smov [#allocation6]  }
 0x1ce   : > { %s1727_s4 = sshll.u32 %s1826_s30, 4  ;;  %s1728_s4 = int_to_ptr.vmem [resolvable:$false] %s1727_s4 }
 0x1cf   : > { %p1725_p7 = pnand %p1724_p6, %p1896_p3  ;;  %s1729_s9 = scalar_lea.vmem %s1728_s4, 32 }
 0x1d0   : > { %p1730_p10 = scmp.lt.s32.totalorder %s1300_s26, %s1728_s4  ;;  %p1731_p11 = scmp.lt.s32.totalorder %s1729_s9, %s1723_s27 }
 0x1d1   : > { %p1726_p8 = pneg %p1725_p7 }
 0x1d2   : > { %p1732_p12 = por %p1731_p11, %p1730_p10 }
 0x1d4   : > { %p1733_p13 = pnand %p1732_p12, %p1726_p8 }
 0x1d6   : > { %1736 = shalt.err (!%p1733_p13)
}
 0x1d7   : > { %s1737_s16 = scalar_lea.hbm %s2265_s21, 16  ;;  %s1741_s15 = scalar_lea.hbm %s2318_s3, 32 }
 0x1d8   : > { %p1738_p0 = scmp.ne.s32.totalorder %s2265_s21, %s1737_s16  ;;  %p1742_p4 = scmp.lt.u32.totalorder %s2265_s21, %s2318_s3 }
 0x1d9   : > { %p1743_p5 = scmp.lt.u32.totalorder %s1741_s15, %s1737_s16  ;;  %p1745_p7 = scmp.lt.u32.totalorder %s1737_s16, %s2265_s21 }
 0x1da   : > { %p1739_p1 = pnand %p1738_p0, %p1896_p3 }
 0x1db   : > { %p1744_p6 = por %p1743_p5, %p1742_p4 }
 0x1dc   : > { %p1740_p2 = pneg %p1739_p1 }
 0x1dd   : > { %p1746_p8 = por %p1745_p7, %p1744_p6 }
 0x1df   : > { %p1747_p10 = pnand %p1746_p8, %p1740_p2 }
 0x1e1   : > { %1750 = shalt.err (!%p1747_p10)
}
 0x1e2   : > { %1582 = dma.vmem_to_hbm [thread:$0]  (%p1896_p3), %s1300_s26, 16, %s2265_s21, %s1274_s10  }
 0x1e3 PF: > { %p1592_p11 = scmp.ge.s32.totalorder %s1821_s19, 2  ;;  %s1311_s7 = sand.u32 1, %s1793_s12  }
 0x1e4   : > { %s1312_s8 = scalar_lea.sflag [#allocation5], %s1311_s7 }
 0x1e5   : > { %p1586_p12 = pnand %p1592_p11, %p1906_p9 }
 0x1e7   : > { %1784 = dma.done.wait (!%p1586_p12), %s1312_s8, 16  }
 0x1e8   : > { %1786 = vsyncadd (!%p1586_p12), %s1312_s8, 4294967280  ;;  %s1320_s20 = scalar_lea.sflag [#allocation7], %s1311_s7 }
 0x1e9   : > { %1788 = dma.done.wait (!%p1586_p12), %s1320_s20, 16  }
 0x1ea   : > { %1790 = vsyncadd (!%p1586_p12), %s1320_s20, 4294967280  ;;  %s20_s19 = sadd.s32 1, %s1821_s19   ;;  %s2321_s12 = smov %s1797_s13 }
 0x1eb   : > { %p17_p13 = scmp.ge.s32.totalorder %s20_s19, 6   ;;  %s2322_s13 = smov %s1801_s14 }
 0x1ec   : > { %s2323_s14 = smov %s1914_s28  ;;  %s2324_s15 = smov %s1813_s17 }
 0x1ed   : > { %s2325_s16 = smov %s1817_s18  ;;  %s2326_s17 = smov %s2329_s22 }
 0x1ee   : > { %s2327_s18 = smov %s2333_s23  ;;  %19 = sbr.rel (!%p17_p13) target bundleno = 7 (0x7), region = 88 }
 0x1f5   :  { %1324 = vsyncpa [#allocation5], 1 }
 0x1f6   :  { %1326 = vsyncpa [#allocation5 + $0x1], 1 }
 0x1f7   :  { %1327 = vsyncpa [#allocation7], 1 }
 0x1f8   :  { %1329 = vsyncpa [#allocation7 + $0x1], 1 }

</bundles_post_ra>
